<compile_context>
chip_gen: v7x
topology: tpu7x:2x2x1
jax: 0.10.0
libtpu: 0.0.40
codegen_flags: <defaults>
</compile_context>

<pallas_src>
import functools
import math

import jax
import jax.numpy as jnp
from jax import lax
from jax.experimental import pallas as pl
from jax.experimental.pallas import tpu as pltpu


# ----------------------------------------------------------------------------
# Fused kernel: one grid step = one batch element, everything stays in VMEM.
# ----------------------------------------------------------------------------
def fused_lora_attn_kernel(x_ref, wqkv_ref, bqkv_ref, a_cat_ref, b_bd_ref,
                           wproj_ref, bproj_ref, out_ref,
                           *, n_head, n_embd, lora_scale, sm_scale):
    C = n_embd
    H = n_head
    D = C // H
    T = x_ref.shape[1]
    cdtype = x_ref.dtype                               # compute dtype (bf16)

    x = x_ref[0]                                       # (T, C) bf16

    # ---- QKV projection (bf16 MXU inputs, f32 accumulation) ----
    qkv = jnp.dot(x, wqkv_ref[...], preferred_element_type=jnp.float32)
    qkv = qkv + bqkv_ref[...]                          # (T, 3C) f32
    q = qkv[:, :C]
    k = qkv[:, C:2 * C]
    v = qkv[:, 2 * C:]

    # ---- LoRA on q and v: two MXU pushes cover BOTH branches ----
    # [q; v] @ [Aq | Av] -> block-diagonal B = [[Bq,0],[0,Bv]] picks the
    # correct (branch, output) pairs; off-diagonal zeros kill cross terms.
    qv = jnp.concatenate([q, v], axis=0).astype(cdtype)            # (2T, C)
    u = jnp.dot(qv, a_cat_ref[...],
                preferred_element_type=jnp.float32) * lora_scale   # (2T, 2r)
    delta = jnp.dot(u.astype(cdtype), b_bd_ref[...],
                    preferred_element_type=jnp.float32)            # (2T, 2C)
    q = q + delta[:T, :C]          # q += ((q @ Aq) * scale) @ Bq
    v = v + delta[T:, C:]          # v += ((v @ Av) * scale) @ Bv

    # ---- causal attention, per head (static loop; C stays lane-contiguous) --
    row = lax.broadcasted_iota(jnp.int32, (T, T), 0)
    col = lax.broadcasted_iota(jnp.int32, (T, T), 1)
    causal = col <= row
    neg_big = jnp.float32(-1e30)   # finite: safe even for fully-masked rows

    contract_last = (((1,), (1,)), ((), ()))           # q @ k^T without .T
    heads = []
    for h in range(H):
        qh = q[:, h * D:(h + 1) * D].astype(cdtype)    # (T, D)
        kh = k[:, h * D:(h + 1) * D].astype(cdtype)
        vh = v[:, h * D:(h + 1) * D].astype(cdtype)

        s = lax.dot_general(qh, kh, contract_last,
                            preferred_element_type=jnp.float32) * sm_scale
        s = jnp.where(causal, s, neg_big)              # (T, T) f32
        m = jnp.max(s, axis=-1, keepdims=True)
        p = jnp.exp(s - m)
        denom = jnp.sum(p, axis=-1, keepdims=True)
        p = p * pl.reciprocal(denom, approx=True)      # EUP, not VALU divide
        heads.append(jnp.dot(p.astype(cdtype), vh,
                             preferred_element_type=jnp.float32))  # (T, D)

    y = jnp.concatenate(heads, axis=-1)                # (T, C) f32

    # ---- output projection ----
    out = jnp.dot(y.astype(cdtype), wproj_ref[...],
                  preferred_element_type=jnp.float32) + bproj_ref[...]
    out_ref[0] = out.astype(out_ref.dtype)


# ----------------------------------------------------------------------------
# Wrapper
# ----------------------------------------------------------------------------
def lora_attention_forward(x, params, n_head, lora_scale,
                           compute_dtype=jnp.bfloat16):
    B, T, C = x.shape
    D = C // n_head
    r = params["aq"].shape[1]

    # bf16 operands for the MXU (biases kept in f32 for the f32 accumulators).
    x_c = x.astype(compute_dtype)
    wqkv = params["wqkv"].astype(compute_dtype)                  # (C, 3C)
    bqkv = params["bqkv"].reshape(1, 3 * C).astype(jnp.float32)  # (1, 3C)
    wproj = params["wproj"].astype(compute_dtype)                # (C, C)
    bproj = params["bproj"].reshape(1, C).astype(jnp.float32)    # (1, C)

    # Merged LoRA operands: A_cat = [Aq | Av], B_bd = [[Bq, 0], [0, Bv]].
    a_cat = jnp.concatenate([params["aq"], params["av"]],
                            axis=1).astype(compute_dtype)        # (C, 2r)
    b_bd = jnp.zeros((2 * r, 2 * C), jnp.float32)
    b_bd = b_bd.at[:r, :C].set(params["bq"])
    b_bd = b_bd.at[r:, C:].set(params["bv"])
    b_bd = b_bd.astype(compute_dtype)                            # (2r, 2C)

    kernel = functools.partial(
        fused_lora_attn_kernel, n_head=n_head, n_embd=C,
        lora_scale=lora_scale, sm_scale=1.0 / math.sqrt(D))

    # Grid over batch only: with full fusion there is no intermediate HBM
    # traffic left to hide; at larger B this axis gives both pipeline depth
    # and megacore sharding ("parallel").
    return pl.pallas_call(
        kernel,
        out_shape=jax.ShapeDtypeStruct((B, T, C), jnp.float32),
        grid=(B,),
        in_specs=[
            pl.BlockSpec((1, T, C), lambda b: (b, 0, 0)),        # x
            pl.BlockSpec((C, 3 * C), lambda b: (0, 0)),          # Wqkv
            pl.BlockSpec((1, 3 * C), lambda b: (0, 0)),          # bqkv
            pl.BlockSpec((C, 2 * r), lambda b: (0, 0)),          # [Aq|Av]
            pl.BlockSpec((2 * r, 2 * C), lambda b: (0, 0)),      # blockdiag(Bq,Bv)
            pl.BlockSpec((C, C), lambda b: (0, 0)),              # Wproj
            pl.BlockSpec((1, C), lambda b: (0, 0)),              # bproj
        ],
        out_specs=pl.BlockSpec((1, T, C), lambda b: (b, 0, 0)),
        compiler_params=pltpu.CompilerParams(
            dimension_semantics=("parallel",),
            vmem_limit_bytes=48 * 1024 * 1024),
    )(x_c, wqkv, bqkv, a_cat, b_bd, wproj, bproj)


# ----------------------------------------------------------------------------
# Pure-JAX f32 reference (mirrors the PyTorch forward exactly)
# ----------------------------------------------------------------------------
def reference_forward(x, params, n_head, lora_scale):
    B, T, C = x.shape
    H, D = n_head, C // n_head
    qkv = x @ params["wqkv"] + params["bqkv"]
    q, k, v = qkv[..., :C], qkv[..., C:2 * C], qkv[..., 2 * C:]
    q = q + ((q @ params["aq"]) * lora_scale) @ params["bq"]
    v = v + ((v @ params["av"]) * lora_scale) @ params["bv"]
    qh = q.reshape(B, T, H, D).transpose(0, 2, 1, 3)
    kh = k.reshape(B, T, H, D).transpose(0, 2, 1, 3)
    vh = v.reshape(B, T, H, D).transpose(0, 2, 1, 3)
    s = jnp.einsum("bhqd,bhkd->bhqk", qh, kh) / math.sqrt(D)
    mask = jnp.tril(jnp.ones((T, T), dtype=bool))
    s = jnp.where(mask, s, -jnp.inf)
    p = jax.nn.softmax(s, axis=-1)
    yh = jnp.einsum("bhqk,bhkd->bhqd", p, vh)
    y = yh.transpose(0, 2, 1, 3).reshape(B, T, C)
    return y @ params["wproj"] + params["bproj"]


if __name__ == "__main__":
    # config: n_embd=32, n_head=4, lora_r=8, lora_a=32; batch=2, seq=8
    B, T, C, H = 2, 8, 32, 4
    rank, alpha = 8, 32
    # LoRA scale is stored as bfloat16 in the PyTorch module (4.0 exactly).
    lora_scale = float(jnp.bfloat16(alpha / rank))

    key = jax.random.PRNGKey(0)
    ks = jax.random.split(key, 9)
    params = {
        # nn.Linear weights pre-transposed to (in, out)
        "wqkv": jax.random.normal(ks[0], (C, 3 * C), jnp.float32) * 0.05,
        "bqkv": jax.random.normal(ks[1], (3 * C,), jnp.float32) * 0.05,
        "wproj": jax.random.normal(ks[2], (C, C), jnp.float32) * 0.05,
        "bproj": jax.random.normal(ks[3], (C,), jnp.float32) * 0.05,
        # LoRA A (kaiming-uniform in torch) and B (zeros in torch; made nonzero
        # here so the LoRA branch actually exercises compute).
        "aq": jax.random.uniform(ks[4], (C, rank), jnp.float32, -0.1, 0.1),
        "bq": jax.random.uniform(ks[5], (rank, C), jnp.float32, -0.1, 0.1),
        "av": jax.random.uniform(ks[6], (C, rank), jnp.float32, -0.1, 0.1),
        "bv": jax.random.uniform(ks[7], (rank, C), jnp.float32, -0.1, 0.1),
    }
    x = jax.random.normal(ks[8], (B, T, C), jnp.float32)

    out = lora_attention_forward(x, params, H, lora_scale)
    out = jax.block_until_ready(out)

    ref = reference_forward(x, params, H, lora_scale)
    assert out.shape == (B, T, C)
    # bf16 MXU inputs with f32 accumulation -> compare with modest tolerance.
    assert jnp.allclose(out, ref, rtol=2e-2, atol=2e-2), "mismatch vs reference"
    print("KERNEL_OK")
</pallas_src>

<mosaic_0001>
module attributes {stable_mosaic.version = 11 : i64} {
  func.func @fused_lora_attn_kernel(%arg0: i32, %arg1: memref<1x8x32xbf16, #tpu.memory_space<vmem>>, %arg2: memref<32x96xbf16, #tpu.memory_space<vmem>>, %arg3: memref<1x96xf32, #tpu.memory_space<vmem>>, %arg4: memref<32x16xbf16, #tpu.memory_space<vmem>>, %arg5: memref<16x64xbf16, #tpu.memory_space<vmem>>, %arg6: memref<32x32xbf16, #tpu.memory_space<vmem>>, %arg7: memref<1x32xf32, #tpu.memory_space<vmem>>, %arg8: memref<1x8x32xf32, #tpu.memory_space<vmem>>) attributes {dimension_semantics = [#tpu.dimension_semantics<parallel>], iteration_bounds = array<i64: 2>, scalar_prefetch = 0 : i64, scratch_operands = 0 : i64, tpu.core_type = #tpu.core_type<tc>, window_params = [{transform_indices = @transform_0, window_bounds = array<i64: 1, 8, 32>}, {pipeline_mode = #tpu.pipeline_mode<synchronous>, transform_indices = @transform_1, window_bounds = array<i64: 32, 96>}, {pipeline_mode = #tpu.pipeline_mode<synchronous>, transform_indices = @transform_2, window_bounds = array<i64: 1, 96>}, {pipeline_mode = #tpu.pipeline_mode<synchronous>, transform_indices = @transform_3, window_bounds = array<i64: 32, 16>}, {pipeline_mode = #tpu.pipeline_mode<synchronous>, transform_indices = @transform_4, window_bounds = array<i64: 16, 64>}, {pipeline_mode = #tpu.pipeline_mode<synchronous>, transform_indices = @transform_5, window_bounds = array<i64: 32, 32>}, {pipeline_mode = #tpu.pipeline_mode<synchronous>, transform_indices = @transform_6, window_bounds = array<i64: 1, 32>}, {transform_indices = @transform_7, window_bounds = array<i64: 1, 8, 32>}]} {
    %c0 = arith.constant 0 : index
    %c0_0 = arith.constant 0 : index
    %c0_1 = arith.constant 0 : index
    %0 = vector.load %arg1[%c0, %c0_0, %c0_1] : memref<1x8x32xbf16, #tpu.memory_space<vmem>>, vector<1x8x32xbf16>
    %1 = vector.shape_cast %0 : vector<1x8x32xbf16> to vector<8x32xbf16>
    %c0_2 = arith.constant 0 : index
    %c0_3 = arith.constant 0 : index
    %2 = vector.load %arg2[%c0_2, %c0_3] : memref<32x96xbf16, #tpu.memory_space<vmem>>, vector<32x96xbf16>
    %cst = arith.constant dense<0.000000e+00> : vector<8x96xf32>
    %3 = tpu.matmul %1, %2, %cst {dimension_numbers = #tpu.dot_dimension_numbers<[1], [0], [0], [1], [0, 0, 1, 1], [], []>} : vector<8x32xbf16>, vector<32x96xbf16>, vector<8x96xf32> -> vector<8x96xf32>
    %c0_4 = arith.constant 0 : index
    %c0_5 = arith.constant 0 : index
    %4 = vector.load %arg3[%c0_4, %c0_5] : memref<1x96xf32, #tpu.memory_space<vmem>>, vector<1x96xf32>
    %5 = vector.broadcast %4 : vector<1x96xf32> to vector<8x96xf32>
    %6 = arith.addf %3, %5 : vector<8x96xf32>
    %7 = vector.extract_strided_slice %6 {offsets = [0, 0], sizes = [8, 32], strides = [1, 1]} : vector<8x96xf32> to vector<8x32xf32>
    %8 = vector.extract_strided_slice %6 {offsets = [0, 32], sizes = [8, 32], strides = [1, 1]} : vector<8x96xf32> to vector<8x32xf32>
    %9 = vector.extract_strided_slice %6 {offsets = [0, 64], sizes = [8, 32], strides = [1, 1]} : vector<8x96xf32> to vector<8x32xf32>
    %10 = tpu.concatenate %7, %9 in 0 : vector<8x32xf32>, vector<8x32xf32> -> vector<16x32xf32>
    %11 = arith.truncf %10 : vector<16x32xf32> to vector<16x32xbf16>
    %c0_6 = arith.constant 0 : index
    %c0_7 = arith.constant 0 : index
    %12 = vector.load %arg4[%c0_6, %c0_7] : memref<32x16xbf16, #tpu.memory_space<vmem>>, vector<32x16xbf16>
    %cst_8 = arith.constant dense<0.000000e+00> : vector<16x16xf32>
    %13 = tpu.matmul %11, %12, %cst_8 {dimension_numbers = #tpu.dot_dimension_numbers<[1], [0], [0], [1], [0, 0, 1, 1], [], []>} : vector<16x32xbf16>, vector<32x16xbf16>, vector<16x16xf32> -> vector<16x16xf32>
    %cst_9 = arith.constant 4.000000e+00 : f32
    %14 = vector.broadcast %cst_9 : f32 to vector<16x16xf32>
    %15 = arith.mulf %13, %14 : vector<16x16xf32>
    %16 = arith.truncf %15 : vector<16x16xf32> to vector<16x16xbf16>
    %c0_10 = arith.constant 0 : index
    %c0_11 = arith.constant 0 : index
    %17 = vector.load %arg5[%c0_10, %c0_11] : memref<16x64xbf16, #tpu.memory_space<vmem>>, vector<16x64xbf16>
    %cst_12 = arith.constant dense<0.000000e+00> : vector<16x64xf32>
    %18 = tpu.matmul %16, %17, %cst_12 {dimension_numbers = #tpu.dot_dimension_numbers<[1], [0], [0], [1], [0, 0, 1, 1], [], []>} : vector<16x16xbf16>, vector<16x64xbf16>, vector<16x64xf32> -> vector<16x64xf32>
    %19 = vector.extract_strided_slice %18 {offsets = [0, 0], sizes = [8, 32], strides = [1, 1]} : vector<16x64xf32> to vector<8x32xf32>
    %20 = arith.addf %7, %19 : vector<8x32xf32>
    %21 = vector.extract_strided_slice %18 {offsets = [8, 32], sizes = [8, 32], strides = [1, 1]} : vector<16x64xf32> to vector<8x32xf32>
    %22 = arith.addf %9, %21 : vector<8x32xf32>
    %23 = tpu.iota {dimensions = array<i32: 0>} : vector<8x8xi32>
    %24 = tpu.iota {dimensions = array<i32: 1>} : vector<8x8xi32>
    %25 = arith.cmpi sle, %24, %23 : vector<8x8xi32>
    %26 = vector.extract_strided_slice %20 {offsets = [0, 0], sizes = [8, 8], strides = [1, 1]} : vector<8x32xf32> to vector<8x8xf32>
    %27 = arith.truncf %26 : vector<8x8xf32> to vector<8x8xbf16>
    %28 = vector.extract_strided_slice %8 {offsets = [0, 0], sizes = [8, 8], strides = [1, 1]} : vector<8x32xf32> to vector<8x8xf32>
    %29 = arith.truncf %28 : vector<8x8xf32> to vector<8x8xbf16>
    %30 = vector.extract_strided_slice %22 {offsets = [0, 0], sizes = [8, 8], strides = [1, 1]} : vector<8x32xf32> to vector<8x8xf32>
    %31 = arith.truncf %30 : vector<8x8xf32> to vector<8x8xbf16>
    %cst_13 = arith.constant dense<0.000000e+00> : vector<8x8xf32>
    %32 = tpu.matmul %27, %29, %cst_13 {dimension_numbers = #tpu.dot_dimension_numbers<[1], [1], [0], [0], [0, 0, 1, 0], [], []>} : vector<8x8xbf16>, vector<8x8xbf16>, vector<8x8xf32> -> vector<8x8xf32>
    %cst_14 = arith.constant 0.353553385 : f32
    %33 = vector.broadcast %cst_14 : f32 to vector<8x8xf32>
    %34 = arith.mulf %32, %33 : vector<8x8xf32>
    %cst_15 = arith.constant -1.000000e+30 : f32
    %35 = vector.broadcast %cst_15 : f32 to vector<8x8xf32>
    %36 = arith.select %25, %34, %35 : vector<8x8xi1>, vector<8x8xf32>
    %cst_16 = arith.constant dense<0xFF800000> : vector<8xf32>
    %37 = vector.multi_reduction <maximumf>, %36, %cst_16 [1] : vector<8x8xf32> to vector<8xf32>
    %38 = vector.shape_cast %37 : vector<8xf32> to vector<8x1xf32>
    %39 = vector.broadcast %38 : vector<8x1xf32> to vector<8x8xf32>
    %40 = arith.subf %36, %39 : vector<8x8xf32>
    %41 = math.exp %40 : vector<8x8xf32>
    %cst_17 = arith.constant dense<0.000000e+00> : vector<8xf32>
    %42 = vector.multi_reduction <add>, %41, %cst_17 [1] : vector<8x8xf32> to vector<8xf32>
    %43 = vector.shape_cast %42 : vector<8xf32> to vector<8x1xf32>
    %44 = tpu.reciprocal %43 {approx = true} : vector<8x1xf32> -> vector<8x1xf32>
    %45 = vector.broadcast %44 : vector<8x1xf32> to vector<8x8xf32>
    %46 = arith.mulf %41, %45 : vector<8x8xf32>
    %47 = arith.truncf %46 : vector<8x8xf32> to vector<8x8xbf16>
    %cst_18 = arith.constant dense<0.000000e+00> : vector<8x8xf32>
    %48 = tpu.matmul %47, %31, %cst_18 {dimension_numbers = #tpu.dot_dimension_numbers<[1], [0], [0], [1], [0, 0, 1, 1], [], []>} : vector<8x8xbf16>, vector<8x8xbf16>, vector<8x8xf32> -> vector<8x8xf32>
    %49 = vector.extract_strided_slice %20 {offsets = [0, 8], sizes = [8, 8], strides = [1, 1]} : vector<8x32xf32> to vector<8x8xf32>
    %50 = arith.truncf %49 : vector<8x8xf32> to vector<8x8xbf16>
    %51 = vector.extract_strided_slice %8 {offsets = [0, 8], sizes = [8, 8], strides = [1, 1]} : vector<8x32xf32> to vector<8x8xf32>
    %52 = arith.truncf %51 : vector<8x8xf32> to vector<8x8xbf16>
    %53 = vector.extract_strided_slice %22 {offsets = [0, 8], sizes = [8, 8], strides = [1, 1]} : vector<8x32xf32> to vector<8x8xf32>
    %54 = arith.truncf %53 : vector<8x8xf32> to vector<8x8xbf16>
    %cst_19 = arith.constant dense<0.000000e+00> : vector<8x8xf32>
    %55 = tpu.matmul %50, %52, %cst_19 {dimension_numbers = #tpu.dot_dimension_numbers<[1], [1], [0], [0], [0, 0, 1, 0], [], []>} : vector<8x8xbf16>, vector<8x8xbf16>, vector<8x8xf32> -> vector<8x8xf32>
    %cst_20 = arith.constant 0.353553385 : f32
    %56 = vector.broadcast %cst_20 : f32 to vector<8x8xf32>
    %57 = arith.mulf %55, %56 : vector<8x8xf32>
    %cst_21 = arith.constant -1.000000e+30 : f32
    %58 = vector.broadcast %cst_21 : f32 to vector<8x8xf32>
    %59 = arith.select %25, %57, %58 : vector<8x8xi1>, vector<8x8xf32>
    %cst_22 = arith.constant dense<0xFF800000> : vector<8xf32>
    %60 = vector.multi_reduction <maximumf>, %59, %cst_22 [1] : vector<8x8xf32> to vector<8xf32>
    %61 = vector.shape_cast %60 : vector<8xf32> to vector<8x1xf32>
    %62 = vector.broadcast %61 : vector<8x1xf32> to vector<8x8xf32>
    %63 = arith.subf %59, %62 : vector<8x8xf32>
    %64 = math.exp %63 : vector<8x8xf32>
    %cst_23 = arith.constant dense<0.000000e+00> : vector<8xf32>
    %65 = vector.multi_reduction <add>, %64, %cst_23 [1] : vector<8x8xf32> to vector<8xf32>
    %66 = vector.shape_cast %65 : vector<8xf32> to vector<8x1xf32>
    %67 = tpu.reciprocal %66 {approx = true} : vector<8x1xf32> -> vector<8x1xf32>
    %68 = vector.broadcast %67 : vector<8x1xf32> to vector<8x8xf32>
    %69 = arith.mulf %64, %68 : vector<8x8xf32>
    %70 = arith.truncf %69 : vector<8x8xf32> to vector<8x8xbf16>
    %cst_24 = arith.constant dense<0.000000e+00> : vector<8x8xf32>
    %71 = tpu.matmul %70, %54, %cst_24 {dimension_numbers = #tpu.dot_dimension_numbers<[1], [0], [0], [1], [0, 0, 1, 1], [], []>} : vector<8x8xbf16>, vector<8x8xbf16>, vector<8x8xf32> -> vector<8x8xf32>
    %72 = vector.extract_strided_slice %20 {offsets = [0, 16], sizes = [8, 8], strides = [1, 1]} : vector<8x32xf32> to vector<8x8xf32>
    %73 = arith.truncf %72 : vector<8x8xf32> to vector<8x8xbf16>
    %74 = vector.extract_strided_slice %8 {offsets = [0, 16], sizes = [8, 8], strides = [1, 1]} : vector<8x32xf32> to vector<8x8xf32>
    %75 = arith.truncf %74 : vector<8x8xf32> to vector<8x8xbf16>
    %76 = vector.extract_strided_slice %22 {offsets = [0, 16], sizes = [8, 8], strides = [1, 1]} : vector<8x32xf32> to vector<8x8xf32>
    %77 = arith.truncf %76 : vector<8x8xf32> to vector<8x8xbf16>
    %cst_25 = arith.constant dense<0.000000e+00> : vector<8x8xf32>
    %78 = tpu.matmul %73, %75, %cst_25 {dimension_numbers = #tpu.dot_dimension_numbers<[1], [1], [0], [0], [0, 0, 1, 0], [], []>} : vector<8x8xbf16>, vector<8x8xbf16>, vector<8x8xf32> -> vector<8x8xf32>
    %cst_26 = arith.constant 0.353553385 : f32
    %79 = vector.broadcast %cst_26 : f32 to vector<8x8xf32>
    %80 = arith.mulf %78, %79 : vector<8x8xf32>
    %cst_27 = arith.constant -1.000000e+30 : f32
    %81 = vector.broadcast %cst_27 : f32 to vector<8x8xf32>
    %82 = arith.select %25, %80, %81 : vector<8x8xi1>, vector<8x8xf32>
    %cst_28 = arith.constant dense<0xFF800000> : vector<8xf32>
    %83 = vector.multi_reduction <maximumf>, %82, %cst_28 [1] : vector<8x8xf32> to vector<8xf32>
    %84 = vector.shape_cast %83 : vector<8xf32> to vector<8x1xf32>
    %85 = vector.broadcast %84 : vector<8x1xf32> to vector<8x8xf32>
    %86 = arith.subf %82, %85 : vector<8x8xf32>
    %87 = math.exp %86 : vector<8x8xf32>
    %cst_29 = arith.constant dense<0.000000e+00> : vector<8xf32>
    %88 = vector.multi_reduction <add>, %87, %cst_29 [1] : vector<8x8xf32> to vector<8xf32>
    %89 = vector.shape_cast %88 : vector<8xf32> to vector<8x1xf32>
    %90 = tpu.reciprocal %89 {approx = true} : vector<8x1xf32> -> vector<8x1xf32>
    %91 = vector.broadcast %90 : vector<8x1xf32> to vector<8x8xf32>
    %92 = arith.mulf %87, %91 : vector<8x8xf32>
    %93 = arith.truncf %92 : vector<8x8xf32> to vector<8x8xbf16>
    %cst_30 = arith.constant dense<0.000000e+00> : vector<8x8xf32>
    %94 = tpu.matmul %93, %77, %cst_30 {dimension_numbers = #tpu.dot_dimension_numbers<[1], [0], [0], [1], [0, 0, 1, 1], [], []>} : vector<8x8xbf16>, vector<8x8xbf16>, vector<8x8xf32> -> vector<8x8xf32>
    %95 = vector.extract_strided_slice %20 {offsets = [0, 24], sizes = [8, 8], strides = [1, 1]} : vector<8x32xf32> to vector<8x8xf32>
    %96 = arith.truncf %95 : vector<8x8xf32> to vector<8x8xbf16>
    %97 = vector.extract_strided_slice %8 {offsets = [0, 24], sizes = [8, 8], strides = [1, 1]} : vector<8x32xf32> to vector<8x8xf32>
    %98 = arith.truncf %97 : vector<8x8xf32> to vector<8x8xbf16>
    %99 = vector.extract_strided_slice %22 {offsets = [0, 24], sizes = [8, 8], strides = [1, 1]} : vector<8x32xf32> to vector<8x8xf32>
    %100 = arith.truncf %99 : vector<8x8xf32> to vector<8x8xbf16>
    %cst_31 = arith.constant dense<0.000000e+00> : vector<8x8xf32>
    %101 = tpu.matmul %96, %98, %cst_31 {dimension_numbers = #tpu.dot_dimension_numbers<[1], [1], [0], [0], [0, 0, 1, 0], [], []>} : vector<8x8xbf16>, vector<8x8xbf16>, vector<8x8xf32> -> vector<8x8xf32>
    %cst_32 = arith.constant 0.353553385 : f32
    %102 = vector.broadcast %cst_32 : f32 to vector<8x8xf32>
    %103 = arith.mulf %101, %102 : vector<8x8xf32>
    %cst_33 = arith.constant -1.000000e+30 : f32
    %104 = vector.broadcast %cst_33 : f32 to vector<8x8xf32>
    %105 = arith.select %25, %103, %104 : vector<8x8xi1>, vector<8x8xf32>
    %cst_34 = arith.constant dense<0xFF800000> : vector<8xf32>
    %106 = vector.multi_reduction <maximumf>, %105, %cst_34 [1] : vector<8x8xf32> to vector<8xf32>
    %107 = vector.shape_cast %106 : vector<8xf32> to vector<8x1xf32>
    %108 = vector.broadcast %107 : vector<8x1xf32> to vector<8x8xf32>
    %109 = arith.subf %105, %108 : vector<8x8xf32>
    %110 = math.exp %109 : vector<8x8xf32>
    %cst_35 = arith.constant dense<0.000000e+00> : vector<8xf32>
    %111 = vector.multi_reduction <add>, %110, %cst_35 [1] : vector<8x8xf32> to vector<8xf32>
    %112 = vector.shape_cast %111 : vector<8xf32> to vector<8x1xf32>
    %113 = tpu.reciprocal %112 {approx = true} : vector<8x1xf32> -> vector<8x1xf32>
    %114 = vector.broadcast %113 : vector<8x1xf32> to vector<8x8xf32>
    %115 = arith.mulf %110, %114 : vector<8x8xf32>
    %116 = arith.truncf %115 : vector<8x8xf32> to vector<8x8xbf16>
    %cst_36 = arith.constant dense<0.000000e+00> : vector<8x8xf32>
    %117 = tpu.matmul %116, %100, %cst_36 {dimension_numbers = #tpu.dot_dimension_numbers<[1], [0], [0], [1], [0, 0, 1, 1], [], []>} : vector<8x8xbf16>, vector<8x8xbf16>, vector<8x8xf32> -> vector<8x8xf32>
    %118 = tpu.concatenate %48, %71, %94, %117 in 1 : vector<8x8xf32>, vector<8x8xf32>, vector<8x8xf32>, vector<8x8xf32> -> vector<8x32xf32>
    %119 = arith.truncf %118 : vector<8x32xf32> to vector<8x32xbf16>
    %c0_37 = arith.constant 0 : index
    %c0_38 = arith.constant 0 : index
    %120 = vector.load %arg6[%c0_37, %c0_38] : memref<32x32xbf16, #tpu.memory_space<vmem>>, vector<32x32xbf16>
    %cst_39 = arith.constant dense<0.000000e+00> : vector<8x32xf32>
    %121 = tpu.matmul %119, %120, %cst_39 {dimension_numbers = #tpu.dot_dimension_numbers<[1], [0], [0], [1], [0, 0, 1, 1], [], []>} : vector<8x32xbf16>, vector<32x32xbf16>, vector<8x32xf32> -> vector<8x32xf32>
    %c0_40 = arith.constant 0 : index
    %c0_41 = arith.constant 0 : index
    %122 = vector.load %arg7[%c0_40, %c0_41] : memref<1x32xf32, #tpu.memory_space<vmem>>, vector<1x32xf32>
    %123 = vector.broadcast %122 : vector<1x32xf32> to vector<8x32xf32>
    %124 = arith.addf %121, %123 : vector<8x32xf32>
    %c0_42 = arith.constant 0 : index
    %c0_43 = arith.constant 0 : index
    %c0_44 = arith.constant 0 : index
    %125 = vector.load %arg8[%c0_42, %c0_43, %c0_44] : memref<1x8x32xf32, #tpu.memory_space<vmem>>, vector<1x8x32xf32>
    %126 = vector.shape_cast %125 : vector<1x8x32xf32> to vector<8x32xf32>
    %127 = vector.shape_cast %124 : vector<8x32xf32> to vector<1x8x32xf32>
    tpu.vector_store %arg8[%c0_42, %c0_43, %c0_44], %127 {strides = array<i32>} : memref<1x8x32xf32, #tpu.memory_space<vmem>>, vector<1x8x32xf32>,
    return
  }
  func.func @transform_0(%arg0: i32) -> (i32, i32, i32) {
    %c0_i32 = arith.constant 0 : i32
    %c0_i32_0 = arith.constant 0 : i32
    %c0_i32_1 = arith.constant 0 : i32
    return %arg0, %c0_i32, %c0_i32_0 : i32, i32, i32
  }
  func.func @transform_1(%arg0: i32) -> (i32, i32) {
    %c0_i32 = arith.constant 0 : i32
    %c0_i32_0 = arith.constant 0 : i32
    %c0_i32_1 = arith.constant 0 : i32
    return %c0_i32, %c0_i32_0 : i32, i32
  }
  func.func @transform_2(%arg0: i32) -> (i32, i32) {
    %c0_i32 = arith.constant 0 : i32
    %c0_i32_0 = arith.constant 0 : i32
    %c0_i32_1 = arith.constant 0 : i32
    return %c0_i32, %c0_i32_0 : i32, i32
  }
  func.func @transform_3(%arg0: i32) -> (i32, i32) {
    %c0_i32 = arith.constant 0 : i32
    %c0_i32_0 = arith.constant 0 : i32
    %c0_i32_1 = arith.constant 0 : i32
    return %c0_i32, %c0_i32_0 : i32, i32
  }
  func.func @transform_4(%arg0: i32) -> (i32, i32) {
    %c0_i32 = arith.constant 0 : i32
    %c0_i32_0 = arith.constant 0 : i32
    %c0_i32_1 = arith.constant 0 : i32
    return %c0_i32, %c0_i32_0 : i32, i32
  }
  func.func @transform_5(%arg0: i32) -> (i32, i32) {
    %c0_i32 = arith.constant 0 : i32
    %c0_i32_0 = arith.constant 0 : i32
    %c0_i32_1 = arith.constant 0 : i32
    return %c0_i32, %c0_i32_0 : i32, i32
  }
  func.func @transform_6(%arg0: i32) -> (i32, i32) {
    %c0_i32 = arith.constant 0 : i32
    %c0_i32_0 = arith.constant 0 : i32
    %c0_i32_1 = arith.constant 0 : i32
    return %c0_i32, %c0_i32_0 : i32, i32
  }
  func.func @transform_7(%arg0: i32) -> (i32, i32, i32) {
    %c0_i32 = arith.constant 0 : i32
    %c0_i32_0 = arith.constant 0 : i32
    %c0_i32_1 = arith.constant 0 : i32
    return %arg0, %c0_i32, %c0_i32_0 : i32, i32, i32
  }
}

</mosaic_0001>

<bundles_post_ra>
// kernel: tpu_custom_call.1
= control target key start
LH: loop header
LB: loop body
LE: loop exit
PB: predicated region body
PF: predicated region fallthrough
CT: control target
= control target key end

     0   :  { %12 = vsyncpa [#allocation3], 0  ;;  %s1881_s0 = inlined_call_operand.hbm [shape: bf16[2,8,32], index: 0, kind: input, shape index: {}]   ;;  %s1882_s1 = inlined_call_operand.vmem [shape: bf16[32,96], index: 1, kind: input, shape index: {}]   ;;  %s1883_s2 = inlined_call_operand.vmem [shape: f32[1,96], index: 2, kind: input, shape index: {}]   ;;  %s1884_s3 = inlined_call_operand.vmem [shape: bf16[32,16], index: 3, kind: input, shape index: {}]   ;;  %s1885_s4 = inlined_call_operand.hbm [shape: bf16[16,64], index: 4, kind: input, shape index: {}]   ;;  %s1886_s5 = inlined_call_operand.vmem [shape: bf16[32,32], index: 5, kind: input, shape index: {}]   ;;  %s1887_s6 = inlined_call_operand.vmem [shape: f32[1,32], index: 6, kind: input, shape index: {}]   ;;  %s1888_s7 = inlined_call_operand.hbm [shape: f32[2,8,32], index: 7, kind: output, shape index: {}]  }
   0x1   :  { %14 = vsyncpa [#allocation3 + $0x1], 0 }
   0x2   :  { %15 = vsyncpa [#allocation6], 0 }
   0x3   :  { %16 = vsyncpa [#allocation4], 0 }
   0x4   :  { %18 = vsyncpa [#allocation4 + $0x1], 0  ;;  %s1573_s24 = smov 0   ;;  %s1575_s25 = smov 0  }
   0x5   :  { %s1577_s26 = smov 0   ;;  %s1579_s27 = smov 0  }
   0x6 LB: > { %s1594_s28 = sadd.s32 4294967295, %s1509_s27   ;;  %s1142_s29 = sadd.s32 4294967294, %s1509_s27   ;;  %s1509_s27 = sphi %s1579_s27, %s1908_s27   ;;  %s1505_s26 = sphi %s1577_s26, %s1907_s26   ;;  %s1501_s25 = sphi %s1575_s25, %s1906_s25   ;;  %s1497_s24 = sphi %s1573_s24, %s1905_s24  }
   0x7   : > { %p44_p0 = scmp.ne.s32.totalorder %s1501_s25, %s1497_s24  ;;  %p1889_p1 = scmp.eq.s32.totalorder %s1594_s28, 0 }
   0x8   : > { %p200_p3 = scmp.eq.s32.totalorder %s1142_s29, 1  ;;  %p1143_p5 = scmp.ge.s32.totalorder %s1509_s27, 1 }
   0x9   : > { %p1603_p4 = por %p1889_p1, %p44_p0  ;;  %p207_p7 = scmp.lt.s32.totalorder %s1509_s27, 3 }
   0xa   : > { %p1608_p6 = por %p200_p3, %p44_p0  ;;  %s1511_s10 = smov [#allocation5]  }
   0xb   : > { %s1892_s30 = scalar_select %p1603_p4, 1, 0 }
   0xc   : > { %s1893_s8 = scalar_select %p1608_p6, 1, 0 }
   0xd   : > { %p1613_p8 = pnand %p1143_p5, %p207_p7  ;;  %s228_s11 = sshll.u32 %s1511_s10, 4  ;;  %s1617_s11 = int_to_ptr.vmem [resolvable:$true] %s228_s11 }
   0xe   : > { %s1629_s13 = sadd.s32 1, %s1509_s27   ;;  %s31_s14 = sadd.s32 1, %s1505_s26 }
   0xf   : > { %s1894_s9 = scalar_select %p1613_p8, 1, 0 }
  0x10   : > { %p1290_p9 = pneg %p1613_p8  ;;  %s28_s15 = ssub.s32 %s1509_s27, %s1629_s13 }
  0x11   : > { %s1381_s18 = scalar_lea.hbm %s1885_s4, 128 }
  0x12   : > { %p1624_p11 = pnand %p1290_p9, %p1889_p1  ;;  %p1382_p12 = scmp.ne.s32.totalorder %s1885_s4, %s1381_s18 }
  0x13   : > { %p1388_p5 = scmp.lt.u32.totalorder %s1381_s18, %s1885_s4 }
  0x14   : > { %p1383_p13 = pneg %p1624_p11 }
  0x16   : > { %p1384_p0 = pnand %p1383_p13, %p1382_p12 }
  0x18   : > { %p1385_p3 = pneg %p1384_p0 }
  0x1a   : > { %p1390_p7 = pnand %p1388_p5, %p1385_p3 }
  0x1c   : > { %1393 = shalt.err (!%p1390_p7)
}
  0x1d   : > { %s1394_s23 = scalar_lea.vmem %s1617_s11, 128  ;;  %p1402_p2 = scmp.lt.s32.totalorder %s1617_s11, %s1617_s11 }
  0x1e   : > { %p1395_p9 = scmp.ne.s32.totalorder %s1617_s11, %s1394_s23  ;;  %p1403_p6 = scmp.lt.s32.totalorder %s1394_s23, %s1394_s23 }
  0x20   : > { %p1397_p10 = pnand %p1395_p9, %p1383_p13  ;;  %p1404_p4 = por %p1403_p6, %p1402_p2 }
  0x22   : > { %p1398_p1 = pneg %p1397_p10 }
  0x24   : > { %p1405_p8 = pnand %p1404_p4, %p1398_p1 }
  0x26   : > { %1408 = shalt.err (!%p1405_p8)
}
  0x27   : > { %s1512_s29 = smov 64   ;;  %s1513_s10 = smov 4  }
  0x28   : > { %1293 = dma.hbm_to_vmem [thread:$0]  (!%p1624_p11), %s1885_s4, 128, %s1617_s11, [#allocation6], %s1512_s29, %s1512_s29, %s1513_s10  }
  0x29   : > { %p29_p2 = scmp.eq.s32.totalorder %s28_s15, 0  ;;  %p38_p1 = scmp.ne.s32.totalorder %s1505_s26, %s1501_s25 }
  0x2a   : > { %p39_p4 = scmp.eq.s32.totalorder %s1509_s27, 0  ;;  %p1303_p6 = scmp.lt.s32.totalorder %s1509_s27, 2 }
  0x2b   : > { %s1660_s18 = scalar_select %p29_p2, %s1505_s26, %s31_s14  }
  0x2c   : > { %p40_p8 = por %p39_p4, %p38_p1  ;;  %p1896_p10 = scmp.eq.s32.totalorder %s1594_s28, 1 }
  0x2d   : > { %s248_s20 = sand.u32 1, %s1505_s26   ;;  %s1147_s21 = sshll.u32 %s1509_s27, 6 }
  0x2e   : > { %p1664_p12 = por %p1896_p10, %p38_p1  ;;  %s1146_s22 = sshll.u32 %s248_s20, 2 }
  0x2f   : > { %s1673_s16 = scalar_lea.hbm %s1881_s0, %s1147_s21  ;;  %s252_s11 = scalar_lea.vmem [#allocation2], %s1146_s22 }
  0x30   : > { %s259_s14 = sshll.u32 %s252_s11, 4  ;;  %p1675_p11 = pnand %p1303_p6, %p40_p8  ;;  %s1679_s14 = int_to_ptr.vmem [resolvable:$true] %s259_s14 }
  0x31   : > { %s249_s29 = scalar_lea.sflag [#allocation3], %s248_s20  ;;  %s1409_s10 = scalar_lea.hbm %s1673_s16, 64 }
  0x32   : > { %p1410_p13 = scmp.ne.s32.totalorder %s1673_s16, %s1409_s10  ;;  %p1411_p0 = pneg %p1675_p11 }
  0x33   : > { %s1414_s22 = scalar_lea.hbm %s1881_s0, 128  ;;  %p1415_p7 = scmp.lt.u32.totalorder %s1673_s16, %s1881_s0 }
  0x34   : > { %p1412_p3 = pnand %p1411_p0, %p1410_p13  ;;  %p1416_p9 = scmp.lt.u32.totalorder %s1414_s22, %s1409_s10 }
  0x35   : > { %p1418_p1 = scmp.lt.u32.totalorder %s1409_s10, %s1673_s16 }
  0x36   : > { %p1413_p5 = pneg %p1412_p3  ;;  %p1417_p2 = por %p1416_p9, %p1415_p7 }
  0x38   : > { %p1419_p4 = por %p1418_p1, %p1417_p2 }
  0x3a   : > { %p1420_p6 = pnand %p1419_p4, %p1413_p5 }
  0x3c   : > { %1423 = shalt.err (!%p1420_p6)
}
  0x3d   : > { %s1424_s20 = scalar_lea.vmem %s1679_s14, 64  ;;  %s1514_s11 = smov [#allocation2]  }
  0x3e   : > { %p1425_p8 = scmp.ne.s32.totalorder %s1679_s14, %s1424_s20  ;;  %s1429_s17 = sshll.u32 %s1514_s11, 4  ;;  %s1430_s17 = int_to_ptr.vmem [resolvable:$false] %s1429_s17 }
  0x3f   : > { %s1431_s21 = scalar_lea.vmem %s1430_s17, 128  ;;  %p1432_p3 = scmp.lt.s32.totalorder %s1679_s14, %s1430_s17 }
  0x40   : > { %p1427_p10 = pnand %p1425_p8, %p1411_p0  ;;  %p1433_p7 = scmp.lt.s32.totalorder %s1431_s21, %s1424_s20 }
  0x42   : > { %p1428_p13 = pneg %p1427_p10  ;;  %p1434_p9 = por %p1433_p7, %p1432_p3 }
  0x44   : > { %p1435_p2 = pnand %p1434_p9, %p1428_p13 }
  0x46   : > { %1438 = shalt.err (!%p1435_p2)
}
  0x47   : > { %1297 = dma.hbm_to_vmem [thread:$0]  (!%p1675_p11), %s1673_s16, 64, %s1679_s14, %s249_s29  }
  0x48   : > { %p1899_p5 = scmp.ne.s32.totalorder %s1894_s9, 0 }
  0x49   : > { %s1709_s10 = sand.u32 (!%p1899_p5), 1, %s1501_s25   ;;  %p1900_p0 = scmp.ne.s32.totalorder (!%p1899_p5), %s1892_s30, 0 }
  0x4a   : > { %268 = sbr.rel (%p1899_p5) target bundleno = 2089 (0x829), region = 48  ;;  %s1149_s22 = sshll.u32 (!%p1899_p5), %s1709_s10, 2 }
  0x4b   : > { %s271_s12 = scalar_lea.sflag (!%p1899_p5), [#allocation3], %s1709_s10  ;;  %s274_s23 = scalar_lea.vmem (!%p1899_p5), [#allocation2], %s1149_s22 }
  0x51   : > { %1484 = dma.done.wait (%p1900_p0), %s271_s12, 64  }
  0x52   : > { %1486 = vsyncadd (%p1900_p0), %s271_s12, 4294967232  ;;  %p1901_p1 = scmp.eq.s32.totalorder %s1594_s28, 0 }
  0x54   : > { %1488 = dma.done.wait (%p1901_p1), [#allocation6], 128   ;;  %p1902_p11 = pmov %p1901_p1 }
  0x55   : > { %v1515_v0 = vmov 0.0   ;;  %vm1516_vm0 = vmmov 0   ;;  %v1358_v1 = vld [vmem:[%s1882_s1] sm:$0xff]   ;;  %v1359_v2 = vld [vmem:[%s1882_s1 + $0x8] sm:$0xff]   ;;  %vm334_vm1 = vcmask 261120   ;;  %s1517_s22 = smov 64   ;;  %v505_v40 = vlaneseq }
  0x56   : > { %1490 = vsyncadd (%p1902_p11), [#allocation6], 4294967168  ;;  %1204 = vmatprep.subr.bf16.mxu0 %v1515_v0  ;;  %1208 = vmatprep.mubr.msk.bf16.mxu0 %vm1516_vm0, %v1515_v0  ;;  %v310_v3 = vld [vmem:[%s274_s23] sm:$0xf]  ;;  %v1361_v5 = vld [vmem:[%s1884_s3 + $0x8] sm:$0xff]   ;;  %s1518_s12 = smov 88  }
  0x57   : > { %1212 = vmatprep.subr.bf16.mxu1 %v1515_v0  ;;  %1216 = vmatprep.mubr.msk.bf16.mxu1 %vm1516_vm0, %v1515_v0  ;;  %v1360_v4 = vld [vmem:[%s1884_s3] sm:$0xff]   ;;  %s1519_s23 = smov 96   ;;  %s1520_s30 = smov 80   ;;  %vm516_vm2 = vcmask 64512   ;;  %v1362_v17 = vld [vmem:[#allocation5] sm:$0xff]   ;;  %vm454_vm3 = vcmask 130048  }
  0x58   : > { %1205 = vmatpush3.bf16.msra.mxu0 %v1358_v1  ;;  %1213 = vmatpush3.bf16.msra.mxu1 %v1360_v4  ;;  %v1152_v6 = vld [vmem:[%s1883_s2] ss:$0 sm:$0xff]  ;;  %s1521_s9 = smov 72   ;;  %s1522_s16 = smov 120   ;;  %v506_v41 = vshrl.u32 %v505_v40, 7  ;;  %v508_v42 = vand.u32 127, %v505_v40 }
  0x59   : > { %1206 = vmatprep.subr.bf16.mxu0 %v1515_v0  ;;  %1214 = vmatprep.subr.bf16.mxu1 %v1515_v0  ;;  %s1523_s14 = smov 112   ;;  %s1524_s15 = smov 104   ;;  %vm583_vm5 = vcmask 1043456   ;;  %vm978_vm6 = vcmask 195584  }
  0x5a   : > { %vm509_vm4 = vcmp.le.s32.totalorder %v508_v42, %v506_v41  ;;  %s1525_s29 = smov 32   ;;  %s1526_s20 = smov 48  }
  0x5b   : > { %s1527_s11 = smov 40   ;;  %s1528_s17 = smov 56  }
  0x5c   : > { %1207 = vmatpush3.bf16.msra.mxu0 %v1359_v2  ;;  %1215 = vmatpush3.bf16.msra.mxu1 %v1361_v5 }
  0x5d   : > { %1220 = vmatprep.subr.bf16.mxu0 %v1515_v0  ;;  %1226 = vmatprep.subr.bf16.mxu1 %v1515_v0 }
  0x5f   : > { %1209 = vmatmul.mubr.msk.bf16.vlgmr.msra.gmra.mrb[0].mxu0 %vm334_vm1, %v310_v3 }
  0x60   : > { %1222 = vmatprep.mubr.msk.bf16.mxu0 %vm1516_vm0, %v1515_v0  ;;  %1221 = vmatpush3.bf16.msra.mxu0 %v1362_v17 }
  0x61   : > { %1232 = vmatprep.subr.bf16.mxu0 %v1515_v0 }
 0x132   : > { %v372_v7 = vpop.f32.mrb[0].mxu0 }
 0x133   : > { %v1749_v8 = vadd.f32 %v1152_v6, %v372_v7  ;;  %v1210_v9 = vpop.f32.mrb[1].mxu0 }
 0x134   : > { %v375_v10 = vpop.f32.mrb[2].mxu0 }
 0x135   : > { %379 = vrot.lane.b32.xlu0 %v1749_v8, %s1517_s22  ;;  %v1211_v11 = vpop.f32.mrb[3].mxu0  ;;  %v511_v12 = vpack.c.bf16 %v1749_v8, %v1749_v8 }
 0x137   : > { %630 = vrot.lane.b32.xlu1 %v511_v12, %s1518_s12  ;;  %s1529_s12 = smov 8  }
 0x139   : > { %514 = vrot.lane.b32.xlu0 %v511_v12, %s1519_s23 }
 0x13d   : > { %742 = vrot.lane.b32.xlu0 %v511_v12, %s1520_s30  ;;  %s1532_s30 = smov [#allocation7]  }
 0x141   : > { %854 = vrot.lane.b32.xlu0 %v511_v12, %s1521_s9  ;;  %s1530_s9 = smov 16  }
 0x1a7   : > { %v380_v13 = vpop.permute.xlu0 %379 }
 0x1a8   : > { %v382_v14 = vpack.c.bf16 %v380_v13, %v1749_v8 }
 0x1a9   : > { %v631_v28 = vpop.permute.xlu1 %630 }
 0x1aa   : > { %1217 = vmatmul.mubr.msk.bf16.vlgmr.msra.gmra.mrb[0].mxu1 %vm334_vm1, %v382_v14  ;;  %v636_v32 = vsel %vm516_vm2, %v631_v28, 0 }
 0x1ab   : > { %v515_v15 = vpop.permute.xlu0 %514  ;;  %1228 = vmatprep.mubr.msk.bf16.mxu1 %vm1516_vm0, %v1515_v0 }
 0x1ac   : > { %v521_v16 = vsel %vm516_vm2, %v515_v15, 0 }
 0x1ad   : > { %1227 = vmatpush3.bf16.xpose.msra.mxu1 %v521_v16 }
 0x1ae   : > { %1238 = vmatprep.subr.bf16.mxu1 %v1515_v0 }
 0x1af   : > { %v743_v33 = vpop.permute.xlu0 %742 }
 0x1b0   : > { %v748_v35 = vsel %vm516_vm2, %v743_v33, 0 }
 0x1b3   : > { %v855_v36 = vpop.permute.xlu0 %854 }
 0x1b4   : > { %v860_v38 = vsel %vm516_vm2, %v855_v36, 0 }
 0x27d   : > { %v436_v18 = vpop.f32.mrb[0].mxu1 }
 0x27e   : > { %v1218_v19 = vpop.f32.mrb[1].mxu1  ;;  %v443_v21 = vmul.f32 4.0, %v436_v18 }
 0x27f   : > { %v439_v20 = vpop.f32.mrb[2].mxu1 }
 0x280   : > { %v444_v22 = vmul.f32 4.0, %v439_v20  ;;  %v1219_v23 = vpop.f32.mrb[3].mxu1 }
 0x282   : > { %v445_v24 = vpack.c.bf16 %v444_v22, %v443_v21 }
 0x284   : > { %1223 = vmatmul.mubr.msk.bf16.vlgmr.msra.gmra.mrb[4].mxu0 %vm454_vm3, %v445_v24 }
 0x285   : > { %1234 = vmatprep.mubr.msk.bf16.mxu0 %vm1516_vm0, %v1515_v0 }
 0x357   : > { %v492_v25 = vpop.f32.mrb[4].mxu0 }
 0x358   : > { %v499_v26 = vadd.f32 %v492_v25, %v1749_v8  ;;  %v1224_v27 = vpop.f32.mrb[5].mxu0 }
 0x359   : > { %v1766_v29 = vpop.f32.mrb[6].mxu0 }
 0x35a   : > { %v510_v30 = vpack.c.bf16 %v499_v26, %v499_v26  ;;  %v1225_v31 = vpop.f32.mrb[7].mxu0 }
 0x35c   : > { %628 = vrot.lane.b32.xlu1 %v510_v30, %s1522_s16  ;;  %1229 = vmatmul.mubr.msk.bf16.vlgmr.msra.gmra.mrb[4].mxu1 %vm516_vm2, %v510_v30  ;;  %s1531_s16 = smov 24  }
 0x35d   : > { %1239 = vmatpush3.bf16.xpose.msra.mxu1 %v636_v32  ;;  %1240 = vmatprep.mubr.msk.bf16.mxu1 %vm1516_vm0, %v1515_v0 }
 0x35e   : > { %1250 = vmatprep.subr.bf16.mxu1 %v1515_v0 }
 0x360   : > { %740 = vrot.lane.b32.xlu1 %v510_v30, %s1523_s14  ;;  %s1151_s14 = sshll.u32 %s1709_s10, 3 }
 0x364   : > { %852 = vrot.lane.b32.xlu1 %v510_v30, %s1524_s15 }
 0x3ce   : > { %v629_v34 = vpop.permute.xlu1 %628 }
 0x3cf   : > { %1241 = vmatmul.mubr.msk.bf16.vlgmr.msra.gmra.mrb[8].mxu1 %vm516_vm2, %v629_v34 }
 0x3d0   : > { %1251 = vmatpush3.bf16.xpose.msra.mxu1 %v748_v35  ;;  %1252 = vmatprep.mubr.msk.bf16.mxu1 %vm1516_vm0, %v1515_v0 }
 0x3d1   : > { %1262 = vmatprep.subr.bf16.mxu1 %v1515_v0 }
 0x3d2   : > { %v741_v37 = vpop.permute.xlu1 %740 }
 0x3d6   : > { %v853_v39 = vpop.permute.xlu1 %852 }
 0x3d7   : > { %1253 = vmatmul.mubr.msk.bf16.vlgmr.msra.gmra.mrb[12].mxu1 %vm516_vm2, %v741_v37 }
 0x3d8   : > { %1263 = vmatpush3.bf16.xpose.msra.mxu1 %v860_v38  ;;  %1264 = vmatprep.mubr.msk.bf16.mxu1 %vm1516_vm0, %v1515_v0 }
 0x3d9   : > { %1274 = vmatprep.subr.bf16.mxu1 %v1515_v0 }
 0x3df   : > { %1265 = vmatmul.mubr.msk.bf16.vlgmr.msra.gmra.mrb[16].mxu1 %vm516_vm2, %v853_v39 }
 0x3e0   : > { %1278 = vmatprep.mubr.msk.bf16.mxu1 %vm1516_vm0, %v1515_v0 }
 0x42f   : > { %v557_v43 = vpop.f32.mrb[4].mxu1 }
 0x430   : > { %v563_v44 = vmul.f32 0.35355338, %v557_v43  ;;  %v1230_v45 = vpop.f32.mrb[5].mxu1 }
 0x431   : > { %v560_v46 = vpop.f32.mrb[6].mxu1 }
 0x432   : > { %v1231_v47 = vpop.f32.mrb[7].mxu1  ;;  %v564_v48 = vsel %vm509_vm4, %v563_v44, -1e+30 }
 0x433   : > { %v565_v49 = vsel %vm516_vm2, %v564_v48, -inf }
 0x434   : > { %566 = vmax.xlane.f32.xlu0 %v565_v49 }
 0x4a2   : > { %v672_v50 = vpop.f32.mrb[8].mxu1 }
 0x4a3   : > { %v678_v51 = vmul.f32 0.35355338, %v672_v50  ;;  %v1242_v52 = vpop.f32.mrb[9].mxu1 }
 0x4a4   : > { %v675_v53 = vpop.f32.mrb[10].mxu1 }
 0x4a5   : > { %v1243_v54 = vpop.f32.mrb[11].mxu1  ;;  %v679_v55 = vsel %vm509_vm4, %v678_v51, -1e+30 }
 0x4a6   : > { %v680_v56 = vsel %vm516_vm2, %v679_v55, -inf }
 0x4a7   : > { %681 = vmax.xlane.f32.xlu1 %v680_v56 }
 0x4aa   : > { %v784_v57 = vpop.f32.mrb[12].mxu1 }
 0x4ab   : > { %v790_v58 = vmul.f32 0.35355338, %v784_v57  ;;  %v1254_v59 = vpop.f32.mrb[13].mxu1 }
 0x4ac   : > { %v787_v60 = vpop.f32.mrb[14].mxu1  ;;  %v1363_v59 = vld [vmem:[%s1886_s5] sm:$0xff]  }
 0x4ad   : > { %v1255_v61 = vpop.f32.mrb[15].mxu1  ;;  %v791_v62 = vsel %vm509_vm4, %v790_v58, -1e+30  ;;  %1275 = vmatpush3.bf16.msra.mxu1 %v1363_v59 }
 0x4ae   : > { %v792_v63 = vsel %vm516_vm2, %v791_v62, -inf  ;;  %1276 = vmatprep.subr.bf16.mxu1 %v1515_v0 }
 0x4af   : > { %793 = vmax.xlane.f32.xlu0 %v792_v63 }
 0x4b2   : > { %v896_v1 = vpop.f32.mrb[16].mxu1 }
 0x4b3   : > { %v902_v2 = vmul.f32 0.35355338, %v896_v1  ;;  %v1266_v3 = vpop.f32.mrb[17].mxu1  ;;  %v1364_v1 = vld [vmem:[%s1886_s5 + $0x8] sm:$0xff]  }
 0x4b4   : > { %v899_v4 = vpop.f32.mrb[18].mxu1  ;;  %1277 = vmatpush3.bf16.msra.mxu1 %v1364_v1 }
 0x4b5   : > { %v1267_v5 = vpop.f32.mrb[19].mxu1  ;;  %v903_v6 = vsel %vm509_vm4, %v902_v2, -1e+30 }
 0x4b6   : > { %v904_v7 = vsel %vm516_vm2, %v903_v6, -inf }
 0x4b7   : > { %905 = vmax.xlane.f32.xlu0 %v904_v7 }
 0x4b8   : > { %501 = vrot.lane.b32.xlu1 %v1766_v29, %s1525_s29 }
 0x4c1   : > { %v567_v9 = vpop.xlane.xlu0 %566 }
 0x4c2   : > { %v568_v10 = vsub.f32 %v564_v48, %v567_v9 }
 0x4c4   : > { %v569_v11 = vmul.f32 1.442695, %v568_v10 }
 0x4c6   : > { %1365 = vpow2.f32 %v569_v11 }
 0x4d0   : > { %v1366_v12 = vpop.eup %1365 }
 0x4d1   : > { %v571_v13 = vsel %vm516_vm2, %v1366_v12, 0.0 }
 0x4d2   : > { %572 = vadd.xlane.f32.xlu0 %v571_v13 }
 0x534   : > { %v682_v14 = vpop.xlane.xlu1 %681 }
 0x535   : > { %v683_v15 = vsub.f32 %v679_v55, %v682_v14 }
 0x537   : > { %v684_v16 = vmul.f32 1.442695, %v683_v15 }
 0x538   : > { %v502_v17 = vpop.permute.xlu1 %501 }
 0x539   : > { %1367 = vpow2.f32 %v684_v16  ;;  %v504_v18 = vadd.f32 %v502_v17, %v1749_v8  ;;  %v1169_v17 = vld [vmem:[%s1887_s6] ss:$0 sm:$0xff] }
 0x53b   : > { %v512_v19 = vpack.c.bf16 %v504_v18, %v504_v18 }
 0x53c   : > { %v794_v20 = vpop.xlane.xlu0 %793 }
 0x53d   : > { %v795_v21 = vsub.f32 %v791_v62, %v794_v20  ;;  %578 = vrot.lane.b32.xlu1 %v512_v19, %s1517_s22 }
 0x53f   : > { %v796_v22 = vmul.f32 1.442695, %v795_v21 }
 0x541   : > { %1369 = vpow2.f32 %v796_v22  ;;  %804 = vrot.lane.b32.xlu1 %v512_v19, %s1526_s20  ;;  %s1174_s20 = sshll.u32 %s1594_s28, 7  ;;  %s1049_s28 = scalar_lea.sflag [#allocation4], %s1709_s10 }
 0x543   : > { %v1368_v23 = vpop.eup %1367 }
 0x544   : > { %v906_v24 = vpop.xlane.xlu0 %905  ;;  %v686_v25 = vsel %vm516_vm2, %v1368_v23, 0.0 }
 0x545   : > { %v907_v26 = vsub.f32 %v903_v6, %v906_v24  ;;  %687 = vadd.xlane.f32.xlu0 %v686_v25  ;;  %916 = vrot.lane.b32.xlu1 %v512_v19, %s1527_s11  ;;  %s308_s11 = scalar_lea.vmem [#allocation7], %s1151_s14 }
 0x547   : > { %v908_v27 = vmul.f32 1.442695, %v907_v26 }
 0x549   : > { %1371 = vpow2.f32 %v908_v27 }
 0x54b   : > { %v1370_v8 = vpop.eup %1369 }
 0x54c   : > { %v798_v28 = vsel %vm516_vm2, %v1370_v8, 0.0 }
 0x54d   : > { %799 = vadd.xlane.f32.xlu0 %v798_v28 }
 0x553   : > { %v1372_v29 = vpop.eup %1371 }
 0x554   : > { %v910_v30 = vsel %vm516_vm2, %v1372_v29, 0.0 }
 0x555   : > { %911 = vadd.xlane.f32.xlu0 %v910_v30 }
 0x55f   : > { %v573_v31 = vpop.xlane.xlu0 %572 }
 0x560   : > { %1373 = vrcp.f32 %v573_v31 }
 0x56a   : > { %v1374_v32 = vpop.eup %1373 }
 0x56b   : > { %692 = vrot.lane.b32.xlu0 %v512_v19, %s1528_s17  ;;  %v575_v33 = vmul.f32 %v1374_v32, %v1366_v12  ;;  %s1062_s17 = sshll.u32 %s308_s11, 4  ;;  %s1838_s17 = int_to_ptr.vmem [resolvable:$true] %s1062_s17 }
 0x56c   : > { %s1439_s23 = scalar_lea.vmem %s1838_s17, 128 }
 0x56d   : > { %v576_v36 = vpack.c.bf16 %v575_v33, %v575_v33  ;;  %p1440_p4 = scmp.ne.s32.totalorder %s1838_s17, %s1439_s23 }
 0x56f   : > { %p1441_p6 = pnand %p1440_p4, %p1664_p12 }
 0x571   : > { %p1442_p8 = pneg %p1441_p6 }
 0x5af   : > { %v579_v34 = vpop.permute.xlu1 %578 }
 0x5b0   : > { %v585_v35 = vsel %vm583_vm5, %v579_v34, 0 }
 0x5b1   : > { %1233 = vmatpush3.bf16.msra.mxu0 %v585_v35 }
 0x5b2   : > { %1244 = vmatprep.subr.bf16.mxu0 %v1515_v0 }
 0x5b3   : > { %v805_v44 = vpop.permute.xlu1 %804 }
 0x5b4   : > { %1235 = vmatmul.mubr.msk.bf16.vlgmr.msra.gmra.mrb[8].mxu0 %vm516_vm2, %v576_v36  ;;  %v810_v47 = vsel %vm583_vm5, %v805_v44, 0 }
 0x5b5   : > { %1246 = vmatprep.mubr.msk.bf16.mxu0 %vm1516_vm0, %v1515_v0 }
 0x5b7   : > { %v917_v49 = vpop.permute.xlu1 %916 }
 0x5b8   : > { %v922_v52 = vsel %vm583_vm5, %v917_v49, 0 }
 0x5d2   : > { %v688_v37 = vpop.xlane.xlu0 %687 }
 0x5d3   : > { %1375 = vrcp.f32 %v688_v37 }
 0x5da   : > { %v800_v38 = vpop.xlane.xlu0 %799 }
 0x5db   : > { %1377 = vrcp.f32 %v800_v38 }
 0x5dd   : > { %v1376_v39 = vpop.eup %1375 }
 0x5de   : > { %v690_v41 = vmul.f32 %v1376_v39, %v1368_v23 }
 0x5e0   : > { %v691_v45 = vpack.c.bf16 %v690_v41, %v690_v41 }
 0x5e2   : > { %v912_v40 = vpop.xlane.xlu0 %911 }
 0x5e3   : > { %1379 = vrcp.f32 %v912_v40 }
 0x5e5   : > { %v1378_v46 = vpop.eup %1377 }
 0x5e6   : > { %v693_v42 = vpop.permute.xlu0 %692  ;;  %v802_v48 = vmul.f32 %v1378_v46, %v1370_v8 }
 0x5e7   : > { %v698_v43 = vsel %vm583_vm5, %v693_v42, 0 }
 0x5e8   : > { %1245 = vmatpush3.bf16.msra.mxu0 %v698_v43  ;;  %v803_v50 = vpack.c.bf16 %v802_v48, %v802_v48 }
 0x5e9   : > { %1256 = vmatprep.subr.bf16.mxu0 %v1515_v0 }
 0x5eb   : > { %1247 = vmatmul.mubr.msk.bf16.vlgmr.msra.gmra.mrb[12].mxu0 %vm516_vm2, %v691_v45 }
 0x5ec   : > { %1257 = vmatpush3.bf16.msra.mxu0 %v810_v47  ;;  %1258 = vmatprep.mubr.msk.bf16.mxu0 %vm1516_vm0, %v1515_v0 }
 0x5ed   : > { %1268 = vmatprep.subr.bf16.mxu0 %v1515_v0  ;;  %v1380_v51 = vpop.eup %1379 }
 0x5ee   : > { %v914_v53 = vmul.f32 %v1380_v51, %v1372_v29 }
 0x5f0   : > { %v915_v54 = vpack.c.bf16 %v914_v53, %v914_v53 }
 0x5f3   : > { %1259 = vmatmul.mubr.msk.bf16.vlgmr.msra.gmra.mrb[16].mxu0 %vm516_vm2, %v803_v50 }
 0x5f4   : > { %1269 = vmatpush3.bf16.msra.mxu0 %v922_v52  ;;  %1270 = vmatprep.mubr.msk.bf16.mxu0 %vm1516_vm0, %v1515_v0 }
 0x5fb   : > { %1271 = vmatmul.mubr.msk.bf16.vlgmr.msra.gmra.mrb[20].mxu0 %vm516_vm2, %v915_v54 }
 0x687   : > { %v621_v55 = vpop.f32.mrb[8].mxu0 }
 0x688   : > { %v1236_v56 = vpop.f32.mrb[9].mxu0 }
 0x689   : > { %v624_v57 = vpop.f32.mrb[10].mxu0 }
 0x68a   : > { %v1237_v58 = vpop.f32.mrb[11].mxu0 }
 0x6be   : > { %v734_v60 = vpop.f32.mrb[12].mxu0 }
 0x6bf   : > { %965 = vrot.lane.b32.xlu1 %v734_v60, %s1529_s12  ;;  %v1248_v61 = vpop.f32.mrb[13].mxu0  ;;  %s1836_s12 = scalar_lea.hbm %s1888_s7, %s1174_s20 }
 0x6c0   : > { %v737_v62 = vpop.f32.mrb[14].mxu0 }
 0x6c1   : > { %v1249_v63 = vpop.f32.mrb[15].mxu0 }
 0x6c6   : > { %v846_v2 = vpop.f32.mrb[16].mxu0 }
 0x6c7   : > { %969 = vrot.lane.b32.xlu1 %v846_v2, %s1530_s9  ;;  %v1260_v3 = vpop.f32.mrb[17].mxu0  ;;  %s1443_s9 = sshll.u32 %s1532_s30, 4  ;;  %s1444_s9 = int_to_ptr.vmem [resolvable:$false] %s1443_s9 }
 0x6c8   : > { %v849_v4 = vpop.f32.mrb[18].mxu0  ;;  %p1446_p10 = scmp.lt.s32.totalorder %s1838_s17, %s1444_s9 }
 0x6c9   : > { %v1261_v5 = vpop.f32.mrb[19].mxu0 }
 0x6ce   : > { %v958_v6 = vpop.f32.mrb[20].mxu0 }
 0x6cf   : > { %973 = vrot.lane.b32.xlu1 %v958_v6, %s1531_s16  ;;  %v1272_v0 = vpop.f32.mrb[21].mxu0  ;;  %s1445_s16 = scalar_lea.vmem %s1444_s9, 256 }
 0x6d0   : > { %v961_v7 = vpop.f32.mrb[22].mxu0  ;;  %p1447_p13 = scmp.lt.s32.totalorder %s1445_s16, %s1439_s23 }
 0x6d1   : > { %v1273_v9 = vpop.f32.mrb[23].mxu0 }
 0x6d2   : > { %p1448_p3 = por %p1447_p13, %p1446_p10 }
 0x6d4   : > { %p1449_p7 = pnand %p1448_p3, %p1442_p8 }
 0x731   : > { %v966_v10 = vpop.permute.xlu1 %965 }
 0x732   : > { %v976_v12 = vsel %vm516_vm2, %v621_v55, %v966_v10 }
 0x739   : > { %v970_v11 = vpop.permute.xlu1 %969 }
 0x73a   : > { %v977_v13 = vsel %vm454_vm3, %v976_v12, %v970_v11 }
 0x741   : > { %v974_v14 = vpop.permute.xlu1 %973 }
 0x742   : > { %v979_v15 = vsel %vm978_vm6, %v977_v13, %v974_v14 }
 0x743   : > { %v980_v16 = vpack.c.bf16 %v979_v15, %v979_v15 }
 0x745   : > { %1279 = vmatmul.mubr.msk.bf16.vlgmr.msra.gmra.mrb[20].mxu1 %vm334_vm1, %v980_v16 }
 0x818   : > { %v1041_v18 = vpop.f32.mrb[20].mxu1 }
 0x819   : > { %v1042_v19 = vadd.f32 %v1169_v17, %v1041_v18  ;;  %v1280_v20 = vpop.f32.mrb[21].mxu1 }
 0x81a   : > { %v1044_v21 = vpop.f32.mrb[22].mxu1 }
 0x81b   : > { %v1281_v22 = vpop.f32.mrb[23].mxu1  ;;  %1047 = vst.msk [vmem:[%s308_s11] sm:$0xff] %vm334_vm1, %v1042_v19 }
 0x81c   : > { %1452 = shalt.err (!%p1449_p7)
}
 0x81d   : > { %s1453_s10 = scalar_lea.hbm %s1836_s12, 128  ;;  %s1457_s29 = scalar_lea.hbm %s1888_s7, 256 }
 0x81e   : > { %p1454_p9 = scmp.ne.s32.totalorder %s1836_s12, %s1453_s10  ;;  %p1458_p0 = scmp.lt.u32.totalorder %s1836_s12, %s1888_s7 }
 0x81f   : > { %p1459_p1 = scmp.lt.u32.totalorder %s1457_s29, %s1453_s10  ;;  %p1461_p4 = scmp.lt.u32.totalorder %s1453_s10, %s1836_s12 }
 0x820   : > { %p1455_p2 = pnand %p1454_p9, %p1664_p12 }
 0x821   : > { %p1460_p11 = por %p1459_p1, %p1458_p0 }
 0x822   : > { %p1456_p5 = pneg %p1455_p2 }
 0x823   : > { %p1462_p6 = por %p1461_p4, %p1460_p11 }
 0x825   : > { %p1463_p8 = pnand %p1462_p6, %p1456_p5 }
 0x827   : > { %1466 = shalt.err (!%p1463_p8)
}
 0x828   : > { %1288 = dma.vmem_to_hbm [thread:$0]  (%p1664_p12), %s1838_s17, 128, %s1836_s12, %s1049_s28  }
 0x829 PF: > { %s1074_s21 = sand.u32 1, %s1497_s24   ;;  %p1903_p10 = scmp.ne.s32.totalorder %s1893_s8, 0 }
 0x82a   : > { %p1904_p13 = scmp.ge.s32.totalorder %s1509_s27, 2  ;;  %s1075_s22 = scalar_lea.sflag [#allocation4], %s1074_s21 }
 0x82c   : > { %p1299_p3 = pnand %p1904_p13, %p1903_p10 }
 0x82e   : > { %1492 = dma.done.wait (!%p1299_p3), %s1075_s22, 128  }
 0x82f   : > { %1494 = vsyncadd (!%p1299_p3), %s1075_s22, 4294967168  ;;  %p21_p7 = scmp.ge.s32.totalorder %s1629_s13, 4   ;;  %s1905_s24 = smov %s1501_s25 }
 0x830   : > { %s1906_s25 = smov %s1505_s26  ;;  %s1907_s26 = smov %s1660_s18 }
 0x831   : > { %s1908_s27 = smov %s1629_s13  ;;  %23 = sbr.rel (!%p21_p7) target bundleno = 6 (0x6), region = 97 }
 0x838   :  { %1080 = vsyncpa [#allocation3], 1 }
 0x839   :  { %1082 = vsyncpa [#allocation3 + $0x1], 1 }
 0x83a   :  { %1083 = vsyncpa [#allocation6], 1 }
 0x83b   :  { %1084 = vsyncpa [#allocation4], 1 }
 0x83c   :  { %1086 = vsyncpa [#allocation4 + $0x1], 1 }

</bundles_post_ra>
